<compile_context>
chip_gen: v7x
topology: tpu7x:2x2x1
jax: 0.10.0
libtpu: 0.0.40
codegen_flags: <defaults>
</compile_context>

<pallas_src>
import functools

import jax
import jax.numpy as jnp
from jax.experimental import pallas as pl
from jax.experimental.pallas import tpu as pltpu


def _round_up(x, m):
    return ((x + m - 1) // m) * m


# --------------------------- kernel bodies ---------------------------------


def _ce_accumulate(logits_ref, labels_ref, acc_ref, *, n_true, tb):
    """acc_ref[0] += sum_i_valid (logsumexp(logits_i) - logits_i[label_i])."""
    pid = pl.program_id(0)
    logits = logits_ref[...].astype(jnp.float32)            # [TB, C]
    labels = labels_ref[...]                                 # [TB, 1] int32
    tb_, c = logits.shape

    row_ids = jax.lax.broadcasted_iota(jnp.int32, (tb_, 1), 0) + pid * tb
    valid = row_ids < n_true                                 # mask padded rows

    class_ids = jax.lax.broadcasted_iota(jnp.int32, (tb_, c), 1)
    # logits[i, label_i] via masked reduce (no materialized f32 one-hot).
    picked = jnp.sum(jnp.where(class_ids == labels, logits, 0.0),
                     axis=1, keepdims=True)                  # [TB, 1]
    m = jnp.max(logits, axis=1, keepdims=True)
    lse = m + jnp.log(jnp.sum(jnp.exp(logits - m), axis=1, keepdims=True))
    acc_ref[0] += jnp.sum(jnp.where(valid, lse - picked, 0.0))


def _ce_kernel(logits_ref, labels_ref, out_ref, acc_ref, *, n_true, tb):
    pid = pl.program_id(0)

    @pl.when(pid == 0)
    def _init():
        acc_ref[0] = 0.0
        acc_ref[1] = 0.0

    _ce_accumulate(logits_ref, labels_ref, acc_ref, n_true=n_true, tb=tb)

    @pl.when(pid == pl.num_programs(0) - 1)
    def _finalize():
        loss_cls = acc_ref[0] * (1.0 / n_true)
        out_ref[0] = loss_cls
        out_ref[1] = loss_cls
        out_ref[2] = 0.0


def _cekd_kernel(logits_ref, labels_ref, feat_ref, feat_t_ref, out_ref, acc_ref,
                 *, n_true, d_true, tb, inv_temp, lamda):
    pid = pl.program_id(0)

    @pl.when(pid == 0)
    def _init():
        acc_ref[0] = 0.0
        acc_ref[1] = 0.0

    _ce_accumulate(logits_ref, labels_ref, acc_ref, n_true=n_true, tb=tb)

    # ---- KL distillation on this batch tile ----
    ys = feat_ref[...].astype(jnp.float32) * inv_temp        # [TB, D]
    yt = feat_t_ref[...].astype(jnp.float32) * inv_temp      # [TB, D]
    tb_, _ = ys.shape

    row_ids = jax.lax.broadcasted_iota(jnp.int32, (tb_, 1), 0) + pid * tb
    valid = row_ids < n_true

    ms = jnp.max(ys, axis=1, keepdims=True)
    log_ss = jnp.log(jnp.sum(jnp.exp(ys - ms), axis=1, keepdims=True))
    log_p_s = (ys - ms) - log_ss                              # log_softmax(student)

    mt = jnp.max(yt, axis=1, keepdims=True)
    e_t = jnp.exp(yt - mt)                                    # single teacher exp,
    s_t = jnp.sum(e_t, axis=1, keepdims=True)                 # reused for both
    log_p_t = (yt - mt) - jnp.log(s_t)
    p_t = e_t / s_t

    kl_elem = jnp.where(valid, p_t * (log_p_t - log_p_s), 0.0)
    acc_ref[1] += jnp.sum(kl_elem)

    @pl.when(pid == pl.num_programs(0) - 1)
    def _finalize():
        loss_cls = acc_ref[0] * (1.0 / n_true)
        loss_kd = acc_ref[1] * (1.0 / (n_true * d_true))
        out_ref[1] = loss_cls
        out_ref[2] = loss_kd
        out_ref[0] = loss_cls + lamda * loss_kd


# ------------------------------ wrapper -------------------------------------


def _pick_tile_rows(n, row_bytes, budget_bytes=12 * 1024 * 1024):
    # 2x for double buffering; tile rows multiple of 8 (sublane), capped at 1024.
    tb = (budget_bytes // (2 * max(int(row_bytes), 1))) // 8 * 8
    tb = int(max(8, min(1024, tb)))
    return min(tb, _round_up(n, 8))


def _pad_rows(x, n_pad):
    n = x.shape[0]
    if n_pad == n:
        return x
    return jnp.pad(x, ((0, n_pad - n),) + ((0, 0),) * (x.ndim - 1))


def cekd_loss(logits, labels, feat=None, feat_teacher=None, *,
              temp=2.0, lamda=1.0, tile_rows=None):
    """Pallas implementation of CEKD_Loss.forward -> (loss, loss_cls, loss_kd)."""
    n, c = logits.shape
    labels2d = labels.astype(jnp.int32).reshape(-1, 1)
    has_kd = (feat is not None) and (feat_teacher is not None) and (lamda != 0)

    row_bytes = c * logits.dtype.itemsize + 4  # + int32 label
    if has_kd:
        d = feat.shape[1]
        row_bytes += d * (feat.dtype.itemsize + feat_teacher.dtype.itemsize)

    tb = tile_rows if tile_rows is not None else _pick_tile_rows(n, row_bytes)
    tb = int(max(8, _round_up(tb, 8)))
    n_pad = _round_up(n, tb)
    grid = (n_pad // tb,)

    logits_p = _pad_rows(logits, n_pad)
    labels_p = _pad_rows(labels2d, n_pad)

    in_specs = [pl.BlockSpec((tb, c), lambda i: (i, 0)),
                pl.BlockSpec((tb, 1), lambda i: (i, 0))]
    inputs = [logits_p, labels_p]

    flops = 6 * n * c
    transcendentals = n * c + n
    bytes_accessed = (logits_p.size * logits_p.dtype.itemsize
                      + labels_p.size * 4 + 12)

    if has_kd:
        feat_p = _pad_rows(feat, n_pad)
        feat_t_p = _pad_rows(feat_teacher, n_pad)
        in_specs += [pl.BlockSpec((tb, d), lambda i: (i, 0)),
                     pl.BlockSpec((tb, d), lambda i: (i, 0))]
        inputs += [feat_p, feat_t_p]
        kernel = functools.partial(
            _cekd_kernel, n_true=n, d_true=d, tb=tb,
            inv_temp=1.0 / float(temp), lamda=float(lamda))
        flops += 14 * n * d
        transcendentals += 2 * n * d + 2 * n
        bytes_accessed += (feat_p.size * feat_p.dtype.itemsize
                           + feat_t_p.size * feat_t_p.dtype.itemsize)
    else:
        kernel = functools.partial(_ce_kernel, n_true=n, tb=tb)

    out = pl.pallas_call(
        kernel,
        out_shape=jax.ShapeDtypeStruct((3,), jnp.float32),
        grid=grid,
        in_specs=in_specs,
        out_specs=pl.BlockSpec(memory_space=pltpu.MemorySpace.SMEM),
        scratch_shapes=[pltpu.SMEM((2,), jnp.float32)],
        compiler_params=pltpu.CompilerParams(
            dimension_semantics=("arbitrary",),
            vmem_limit_bytes=32 * 1024 * 1024),
        cost_estimate=pl.CostEstimate(
            flops=int(flops),
            transcendentals=int(transcendentals),
            bytes_accessed=int(bytes_accessed)),
    )(*inputs)

    return out[0], out[1], out[2]


# ------------------------------ reference -----------------------------------


def _reference(logits, labels, feat, feat_t, temp=2.0, lamda=1.0):
    logits = logits.astype(jnp.float32)
    lse = jax.nn.logsumexp(logits, axis=1)
    picked = jnp.take_along_axis(logits, labels[:, None], axis=1)[:, 0]
    loss_cls = jnp.mean(lse - picked)

    log_p_s = jax.nn.log_softmax(feat.astype(jnp.float32) / temp, axis=1)
    log_p_t = jax.nn.log_softmax(feat_t.astype(jnp.float32) / temp, axis=1)
    p_t = jnp.exp(log_p_t)
    loss_kd = jnp.mean(p_t * (log_p_t - log_p_s))
    return loss_cls + lamda * loss_kd, loss_cls, loss_kd


if __name__ == "__main__":
    key = jax.random.PRNGKey(0)
    k1, k2, k3, k4, k5, k6 = jax.random.split(key, 6)

    batch, num_classes, feat_dim = 8, 32, 32
    logits = jax.random.normal(k1, (batch, num_classes), jnp.float32)
    labels = jax.random.randint(k2, (batch,), 0, num_classes, jnp.int32)
    feat = jax.random.normal(k3, (batch, feat_dim), jnp.float32)
    feat_teacher = jax.random.normal(k4, (batch, feat_dim), jnp.float32)

    # 1) full CE + KD path
    loss, loss_cls, loss_kd = cekd_loss(
        logits, labels, feat, feat_teacher, temp=2.0, lamda=1.0)
    jax.block_until_ready((loss, loss_cls, loss_kd))
    ref = _reference(logits, labels, feat, feat_teacher, temp=2.0, lamda=1.0)
    assert jnp.allclose(loss, ref[0], atol=1e-5, rtol=1e-5), (loss, ref[0])
    assert jnp.allclose(loss_cls, ref[1], atol=1e-5, rtol=1e-5), (loss_cls, ref[1])
    assert jnp.allclose(loss_kd, ref[2], atol=1e-5, rtol=1e-5), (loss_kd, ref[2])

    # 2) CE-only path (feat_teacher=None -> specialized kernel, loss_kd == 0)
    l2, lc2, lk2 = cekd_loss(logits, labels)
    jax.block_until_ready((l2, lc2, lk2))
    assert jnp.allclose(lc2, ref[1], atol=1e-5, rtol=1e-5), (lc2, ref[1])
    assert jnp.allclose(l2, ref[1], atol=1e-5, rtol=1e-5), (l2, ref[1])
    assert float(lk2) == 0.0

    # 3) padded / masked batch (N not a multiple of the tile rows)
    b3 = 13
    lg3 = jax.random.normal(k5, (b3, num_classes), jnp.float32)
    lb3 = jax.random.randint(k6, (b3,), 0, num_classes, jnp.int32)
    ft3 = jax.random.normal(k3, (b3, feat_dim), jnp.float32)
    ftt3 = jax.random.normal(k4, (b3, feat_dim), jnp.float32)
    o3 = cekd_loss(lg3, lb3, ft3, ftt3, temp=2.0, lamda=0.5)
    jax.block_until_ready(o3)
    r3 = _reference(lg3, lb3, ft3, ftt3, temp=2.0, lamda=0.5)
    for a, b in zip(o3, r3):
        assert jnp.allclose(a, b, atol=1e-5, rtol=1e-5), (a, b)

    # 4) multi-step grid (forced small tile -> exercises accumulator across steps)
    b4 = 16
    lg4 = jax.random.normal(k1, (b4, num_classes), jnp.float32)
    lb4 = jax.random.randint(k2, (b4,), 0, num_classes, jnp.int32)
    ft4 = jax.random.normal(k3, (b4, feat_dim), jnp.float32)
    ftt4 = jax.random.normal(k4, (b4, feat_dim), jnp.float32)
    o4 = cekd_loss(lg4, lb4, ft4, ftt4, temp=3.0, lamda=2.0, tile_rows=8)
    jax.block_until_ready(o4)
    r4 = _reference(lg4, lb4, ft4, ftt4, temp=3.0, lamda=2.0)
    for a, b in zip(o4, r4):
        assert jnp.allclose(a, b, atol=1e-5, rtol=1e-5), (a, b)

    print("KERNEL_OK")
</pallas_src>

<mosaic_0001>
module attributes {stable_mosaic.version = 11 : i64} {
  func.func @_cekd_kernel(%arg0: i32, %arg1: memref<8x32xf32, #tpu.memory_space<vmem>>, %arg2: memref<8x1xi32, #tpu.memory_space<vmem>>, %arg3: memref<8x32xf32, #tpu.memory_space<vmem>>, %arg4: memref<8x32xf32, #tpu.memory_space<vmem>>, %arg5: memref<3xf32, #tpu.memory_space<smem>>, %arg6: memref<2xf32, #tpu.memory_space<smem>>) attributes {dimension_semantics = [#tpu.dimension_semantics<arbitrary>], iteration_bounds = array<i64: 1>, scalar_prefetch = 0 : i64, scratch_operands = 1 : i64, tpu.core_type = #tpu.core_type<tc>, window_params = [{transform_indices = @transform_0, window_bounds = array<i64: 8, 32>}, {transform_indices = @transform_1, window_bounds = array<i64: 8, 1>}, {transform_indices = @transform_2, window_bounds = array<i64: 8, 32>}, {transform_indices = @transform_3, window_bounds = array<i64: 8, 32>}, {transform_indices = @transform_4, window_bounds = array<i64: 3>}]} {
    %c0_i32 = arith.constant 0 : i32
    %0 = arith.cmpi eq, %arg0, %c0_i32 : i32
    %1 = arith.extui %0 : i1 to i32
    %c0_i32_0 = arith.constant 0 : i32
    %2 = arith.cmpi ne, %1, %c0_i32_0 : i32
    scf.if %2 {
      %cst_29 = arith.constant 0.000000e+00 : f32
      %c0_30 = arith.constant 0 : index
      %91 = memref.load %arg6[%c0_30] : memref<2xf32, #tpu.memory_space<smem>>
      memref.store %cst_29, %arg6[%c0_30] : memref<2xf32, #tpu.memory_space<smem>>
      %cst_31 = arith.constant 0.000000e+00 : f32
      %c1_32 = arith.constant 1 : index
      %92 = memref.load %arg6[%c1_32] : memref<2xf32, #tpu.memory_space<smem>>
      memref.store %cst_31, %arg6[%c1_32] : memref<2xf32, #tpu.memory_space<smem>>
    } else {
    }
    %c0 = arith.constant 0 : index
    %c0_1 = arith.constant 0 : index
    %3 = vector.load %arg1[%c0, %c0_1] : memref<8x32xf32, #tpu.memory_space<vmem>>, vector<8x32xf32>
    %c0_2 = arith.constant 0 : index
    %c0_3 = arith.constant 0 : index
    %4 = vector.load %arg2[%c0_2, %c0_3] : memref<8x1xi32, #tpu.memory_space<vmem>>, vector<8x1xi32>
    %5 = tpu.iota {dimensions = array<i32: 0>} : vector<8x1xi32>
    %c8_i32 = arith.constant 8 : i32
    %6 = arith.muli %arg0, %c8_i32 : i32
    %7 = vector.broadcast %6 : i32 to vector<8x1xi32>
    %8 = arith.addi %5, %7 : vector<8x1xi32>
    %c8_i32_4 = arith.constant 8 : i32
    %9 = vector.broadcast %c8_i32_4 : i32 to vector<8x1xi32>
    %10 = arith.cmpi slt, %8, %9 : vector<8x1xi32>
    %11 = tpu.iota {dimensions = array<i32: 1>} : vector<8x32xi32>
    %12 = vector.broadcast %4 : vector<8x1xi32> to vector<8x32xi32>
    %13 = arith.cmpi eq, %11, %12 : vector<8x32xi32>
    %cst = arith.constant 0.000000e+00 : f32
    %14 = vector.broadcast %cst : f32 to vector<8x32xf32>
    %15 = arith.select %13, %3, %14 : vector<8x32xi1>, vector<8x32xf32>
    %cst_5 = arith.constant dense<0.000000e+00> : vector<8xf32>
    %16 = vector.multi_reduction <add>, %15, %cst_5 [1] : vector<8x32xf32> to vector<8xf32>
    %17 = vector.shape_cast %16 : vector<8xf32> to vector<8x1xf32>
    %cst_6 = arith.constant dense<0xFF800000> : vector<8xf32>
    %18 = vector.multi_reduction <maximumf>, %3, %cst_6 [1] : vector<8x32xf32> to vector<8xf32>
    %19 = vector.shape_cast %18 : vector<8xf32> to vector<8x1xf32>
    %20 = vector.broadcast %19 : vector<8x1xf32> to vector<8x32xf32>
    %21 = arith.subf %3, %20 : vector<8x32xf32>
    %22 = math.exp %21 : vector<8x32xf32>
    %cst_7 = arith.constant dense<0.000000e+00> : vector<8xf32>
    %23 = vector.multi_reduction <add>, %22, %cst_7 [1] : vector<8x32xf32> to vector<8xf32>
    %24 = vector.shape_cast %23 : vector<8xf32> to vector<8x1xf32>
    %25 = math.log %24 : vector<8x1xf32>
    %26 = arith.addf %19, %25 : vector<8x1xf32>
    %c0_8 = arith.constant 0 : index
    %27 = memref.load %arg6[%c0_8] : memref<2xf32, #tpu.memory_space<smem>>
    %28 = arith.subf %26, %17 : vector<8x1xf32>
    %cst_9 = arith.constant 0.000000e+00 : f32
    %29 = vector.broadcast %cst_9 : f32 to vector<8x1xf32>
    %30 = arith.select %10, %28, %29 : vector<8x1xi1>, vector<8x1xf32>
    %31 = vector.shape_cast %30 : vector<8x1xf32> to vector<1x8x1xf32>
    %cst_10 = arith.constant dense<0.000000e+00> : vector<1xf32>
    %32 = vector.multi_reduction <add>, %31, %cst_10 [1, 2] : vector<1x8x1xf32> to vector<1xf32>
    %33 = vector.shape_cast %32 : vector<1xf32> to vector<1x1x1xf32>
    %34 = vector.extract %33[0, 0, 0] : f32 from vector<1x1x1xf32>
    %35 = arith.addf %27, %34 : f32
    %c0_11 = arith.constant 0 : index
    %36 = memref.load %arg6[%c0_11] : memref<2xf32, #tpu.memory_space<smem>>
    memref.store %35, %arg6[%c0_11] : memref<2xf32, #tpu.memory_space<smem>>
    %c0_12 = arith.constant 0 : index
    %c0_13 = arith.constant 0 : index
    %37 = vector.load %arg3[%c0_12, %c0_13] : memref<8x32xf32, #tpu.memory_space<vmem>>, vector<8x32xf32>
    %cst_14 = arith.constant 5.000000e-01 : f32
    %38 = vector.broadcast %cst_14 : f32 to vector<8x32xf32>
    %39 = arith.mulf %37, %38 : vector<8x32xf32>
    %c0_15 = arith.constant 0 : index
    %c0_16 = arith.constant 0 : index
    %40 = vector.load %arg4[%c0_15, %c0_16] : memref<8x32xf32, #tpu.memory_space<vmem>>, vector<8x32xf32>
    %cst_17 = arith.constant 5.000000e-01 : f32
    %41 = vector.broadcast %cst_17 : f32 to vector<8x32xf32>
    %42 = arith.mulf %40, %41 : vector<8x32xf32>
    %43 = tpu.iota {dimensions = array<i32: 0>} : vector<8x1xi32>
    %c8_i32_18 = arith.constant 8 : i32
    %44 = arith.muli %arg0, %c8_i32_18 : i32
    %45 = vector.broadcast %44 : i32 to vector<8x1xi32>
    %46 = arith.addi %43, %45 : vector<8x1xi32>
    %c8_i32_19 = arith.constant 8 : i32
    %47 = vector.broadcast %c8_i32_19 : i32 to vector<8x1xi32>
    %48 = arith.cmpi slt, %46, %47 : vector<8x1xi32>
    %cst_20 = arith.constant dense<0xFF800000> : vector<8xf32>
    %49 = vector.multi_reduction <maximumf>, %39, %cst_20 [1] : vector<8x32xf32> to vector<8xf32>
    %50 = vector.shape_cast %49 : vector<8xf32> to vector<8x1xf32>
    %51 = vector.broadcast %50 : vector<8x1xf32> to vector<8x32xf32>
    %52 = arith.subf %39, %51 : vector<8x32xf32>
    %53 = math.exp %52 : vector<8x32xf32>
    %cst_21 = arith.constant dense<0.000000e+00> : vector<8xf32>
    %54 = vector.multi_reduction <add>, %53, %cst_21 [1] : vector<8x32xf32> to vector<8xf32>
    %55 = vector.shape_cast %54 : vector<8xf32> to vector<8x1xf32>
    %56 = math.log %55 : vector<8x1xf32>
    %57 = vector.broadcast %50 : vector<8x1xf32> to vector<8x32xf32>
    %58 = arith.subf %39, %57 : vector<8x32xf32>
    %59 = vector.broadcast %56 : vector<8x1xf32> to vector<8x32xf32>
    %60 = arith.subf %58, %59 : vector<8x32xf32>
    %cst_22 = arith.constant dense<0xFF800000> : vector<8xf32>
    %61 = vector.multi_reduction <maximumf>, %42, %cst_22 [1] : vector<8x32xf32> to vector<8xf32>
    %62 = vector.shape_cast %61 : vector<8xf32> to vector<8x1xf32>
    %63 = vector.broadcast %62 : vector<8x1xf32> to vector<8x32xf32>
    %64 = arith.subf %42, %63 : vector<8x32xf32>
    %65 = math.exp %64 : vector<8x32xf32>
    %cst_23 = arith.constant dense<0.000000e+00> : vector<8xf32>
    %66 = vector.multi_reduction <add>, %65, %cst_23 [1] : vector<8x32xf32> to vector<8xf32>
    %67 = vector.shape_cast %66 : vector<8xf32> to vector<8x1xf32>
    %68 = vector.broadcast %62 : vector<8x1xf32> to vector<8x32xf32>
    %69 = arith.subf %42, %68 : vector<8x32xf32>
    %70 = math.log %67 : vector<8x1xf32>
    %71 = vector.broadcast %70 : vector<8x1xf32> to vector<8x32xf32>
    %72 = arith.subf %69, %71 : vector<8x32xf32>
    %73 = vector.broadcast %67 : vector<8x1xf32> to vector<8x32xf32>
    %74 = arith.divf %65, %73 : vector<8x32xf32>
    %75 = arith.subf %72, %60 : vector<8x32xf32>
    %76 = arith.mulf %74, %75 : vector<8x32xf32>
    %cst_24 = arith.constant 0.000000e+00 : f32
    %77 = vector.shape_cast %48 : vector<8x1xi1> to vector<8x1xi1>
    %78 = vector.broadcast %77 : vector<8x1xi1> to vector<8x32xi1>
    %79 = vector.broadcast %cst_24 : f32 to vector<8x32xf32>
    %80 = arith.select %78, %76, %79 : vector<8x32xi1>, vector<8x32xf32>
    %c1 = arith.constant 1 : index
    %81 = memref.load %arg6[%c1] : memref<2xf32, #tpu.memory_space<smem>>
    %82 = vector.shape_cast %80 : vector<8x32xf32> to vector<1x8x32xf32>
    %cst_25 = arith.constant dense<0.000000e+00> : vector<1xf32>
    %83 = vector.multi_reduction <add>, %82, %cst_25 [1, 2] : vector<1x8x32xf32> to vector<1xf32>
    %84 = vector.shape_cast %83 : vector<1xf32> to vector<1x1x1xf32>
    %85 = vector.extract %84[0, 0, 0] : f32 from vector<1x1x1xf32>
    %86 = arith.addf %81, %85 : f32
    %c1_26 = arith.constant 1 : index
    %87 = memref.load %arg6[%c1_26] : memref<2xf32, #tpu.memory_space<smem>>
    memref.store %86, %arg6[%c1_26] : memref<2xf32, #tpu.memory_space<smem>>
    %c0_i32_27 = arith.constant 0 : i32
    %88 = arith.cmpi eq, %arg0, %c0_i32_27 : i32
    %89 = arith.extui %88 : i1 to i32
    %c0_i32_28 = arith.constant 0 : i32
    %90 = arith.cmpi ne, %89, %c0_i32_28 : i32
    scf.if %90 {
      %c0_29 = arith.constant 0 : index
      %91 = memref.load %arg6[%c0_29] : memref<2xf32, #tpu.memory_space<smem>>
      %cst_30 = arith.constant 1.250000e-01 : f32
      %92 = arith.mulf %91, %cst_30 : f32
      %c1_31 = arith.constant 1 : index
      %93 = memref.load %arg6[%c1_31] : memref<2xf32, #tpu.memory_space<smem>>
      %cst_32 = arith.constant 3.906250e-03 : f32
      %94 = arith.mulf %93, %cst_32 : f32
      %c1_33 = arith.constant 1 : index
      %95 = memref.load %arg5[%c1_33] : memref<3xf32, #tpu.memory_space<smem>>
      memref.store %92, %arg5[%c1_33] : memref<3xf32, #tpu.memory_space<smem>>
      %c2 = arith.constant 2 : index
      %96 = memref.load %arg5[%c2] : memref<3xf32, #tpu.memory_space<smem>>
      memref.store %94, %arg5[%c2] : memref<3xf32, #tpu.memory_space<smem>>
      %cst_34 = arith.constant 1.000000e+00 : f32
      %97 = arith.mulf %cst_34, %94 : f32
      %98 = arith.addf %92, %97 : f32
      %c0_35 = arith.constant 0 : index
      %99 = memref.load %arg5[%c0_35] : memref<3xf32, #tpu.memory_space<smem>>
      memref.store %98, %arg5[%c0_35] : memref<3xf32, #tpu.memory_space<smem>>
    } else {
    }
    return
  }
  func.func @transform_0(%arg0: i32) -> (i32, i32) {
    %c0_i32 = arith.constant 0 : i32
    %c0_i32_0 = arith.constant 0 : i32
    return %arg0, %c0_i32 : i32, i32
  }
  func.func @transform_1(%arg0: i32) -> (i32, i32) {
    %c0_i32 = arith.constant 0 : i32
    %c0_i32_0 = arith.constant 0 : i32
    return %arg0, %c0_i32 : i32, i32
  }
  func.func @transform_2(%arg0: i32) -> (i32, i32) {
    %c0_i32 = arith.constant 0 : i32
    %c0_i32_0 = arith.constant 0 : i32
    return %arg0, %c0_i32 : i32, i32
  }
  func.func @transform_3(%arg0: i32) -> (i32, i32) {
    %c0_i32 = arith.constant 0 : i32
    %c0_i32_0 = arith.constant 0 : i32
    return %arg0, %c0_i32 : i32, i32
  }
  func.func @transform_4(%arg0: i32) -> i32 {
    %c0_i32 = arith.constant 0 : i32
    %c0_i32_0 = arith.constant 0 : i32
    return %c0_i32 : i32
  }
}

</mosaic_0001>

<bundles_post_ra>
// kernel: tpu_custom_call.1
= control target key start
LH: loop header
LB: loop body
LE: loop exit
PB: predicated region body
PF: predicated region fallthrough
CT: control target
= control target key end

     0   :  { %9 = vsyncpa [#allocation4], 0  ;;  %s293_s0 = inlined_call_operand.vmem [shape: f32[8,32], index: 0, kind: input, shape index: {}]   ;;  %s294_s1 = inlined_call_operand.vmem [shape: s32[8,1], index: 1, kind: input, shape index: {}]   ;;  %s295_s2 = inlined_call_operand.vmem [shape: f32[8,32], index: 2, kind: input, shape index: {}]   ;;  %s296_s3 = inlined_call_operand.hbm [shape: f32[8,32], index: 3, kind: input, shape index: {}]   ;;  %s297_s4 = inlined_call_operand.hbm [shape: f32[3], index: 4, kind: output, shape index: {}]  }
   0x1   :  { %10 = vsyncpa [#allocation5], 0  ;;  %s224_s15 = smov [#allocation3]   ;;  %s188_s19 = scalar_lea.hbm %s296_s3, 128 }
   0x2   :  { %s23_s16 = sshll.u32 %s224_s15, 4  ;;  %p189_p0 = scmp.ne.s32.totalorder %s296_s3, %s188_s19  ;;  %s24_s16 = int_to_ptr.vmem [resolvable:$true] %s23_s16 }
   0x3   :  { %p192_p1 = scmp.lt.u32.totalorder %s188_s19, %s296_s3 }
   0x5   :  { %p194_p2 = pnand %p192_p1, %p189_p0 }
   0x7   :  { %197 = shalt.err (!%p194_p2)
}
   0x8   :  { %s198_s24 = scalar_lea.vmem %s24_s16, 128  ;;  %p203_p4 = scmp.lt.s32.totalorder %s24_s16, %s24_s16 }
   0x9   :  { %p199_p3 = scmp.ne.s32.totalorder %s24_s16, %s198_s24  ;;  %p204_p5 = scmp.lt.s32.totalorder %s198_s24, %s198_s24 }
   0xb   :  { %p205_p6 = por %p204_p5, %p203_p4 }
   0xd   :  { %p206_p7 = pnand %p205_p6, %p199_p3 }
   0xf   :  { %209 = shalt.err (!%p206_p7)
}
  0x10   :  { %26 = dma.hbm_to_vmem [thread:$0]  %s296_s3, 128, %s24_s16, [#allocation4]  }
  0x11   :  { %220 = dma.done.wait [#allocation4], 128  }
  0x12   :  { %221 = vsyncadd [#allocation4], 4294967168  ;;  %v225_v0 = vmov 0   ;;  %vm53_vm0 = vcmask 261120   ;;  %v86_v1 = vld [vmem:[%s295_s2] sm:$0xff]  ;;  %v46_v19 = vlaneseq  ;;  %vm72_vm2 = vcmask 7168  }
  0x13   :  { %172 = vset.pattern.permute.xlu1 %v225_v0  ;;  %173 = vset.pattern.permute.xlu0 %v225_v0  ;;  %v88_v2 = vld [vmem:[#allocation3] sm:$0xff]  ;;  %v87_v4 = vmul.f32 0.5, %v86_v1  ;;  %s210_s10 = scalar_lea.hbm %s297_s4, 16 }
  0x14   :  { %v38_v3 = vld [vmem:[%s293_s0] sm:$0xff]  ;;  %v89_v5 = vmul.f32 0.5, %v88_v2  ;;  %v47_v22 = vand.u32 127, %v46_v19  ;;  %p211_p8 = scmp.ne.s32.totalorder %s297_s4, %s210_s10  ;;  %p214_p9 = scmp.lt.u32.totalorder %s210_s10, %s297_s4 }
  0x15   :  { %v57_v6 = vsel %vm53_vm0, %v38_v3, -inf  ;;  %v90_v7 = vsel %vm53_vm0, %v87_v4, -inf  ;;  %v39_v9 = vld [vmem:[%s294_s1] sm:$0xff] }
  0x16   :  { %58 = vmax.xlane.f32.xlu1 %v57_v6  ;;  %91 = vmax.xlane.f32.xlu0 %v90_v7  ;;  %v102_v8 = vsel %vm53_vm0, %v89_v5, -inf  ;;  %p216_p10 = pnand %p214_p9, %p211_p8 }
  0x1a   :  { %103 = vmax.xlane.f32.xlu0 %v102_v8 }
  0x27   :  { %49 = vperm.xlu1 %172, %v39_v9  }
  0xa3   :  { %v59_v10 = vpop.xlane.xlu1 %58  ;;  %v92_v11 = vpop.xlane.xlu0 %91 }
  0xa4   :  { %v60_v12 = vsub.f32 %v38_v3, %v59_v10  ;;  %v93_v13 = vsub.f32 %v87_v4, %v92_v11 }
  0xa6   :  { %v94_v14 = vmul.f32 1.442695, %v93_v13  ;;  %v61_v16 = vmul.f32 1.442695, %v60_v12 }
  0xa7   :  { %v104_v15 = vpop.xlane.xlu0 %103  ;;  %v50_v23 = vpop.permute.xlu1 %49 }
  0xa8   :  { %174 = vpow2.f32 %v94_v14  ;;  %v105_v17 = vsub.f32 %v89_v5, %v104_v15  ;;  %vm51_vm1 = vcmp.eq.s32.totalorder %v47_v22, %v50_v23 }
  0xa9   :  { %176 = vpow2.f32 %v61_v16  ;;  %v52_v28 = vsel %vm51_vm1, %v38_v3, 0.0 }
  0xaa   :  { %v106_v18 = vmul.f32 1.442695, %v105_v17  ;;  %v54_v29 = vsel %vm53_vm0, %v52_v28, 0.0 }
  0xac   :  { %178 = vpow2.f32 %v106_v18 }
  0xb2   :  { %v175_v20 = vpop.eup %174 }
  0xb3   :  { %v96_v21 = vsel %vm53_vm0, %v175_v20, 0.0  ;;  %v177_v24 = vpop.eup %176 }
  0xb4   :  { %97 = vadd.xlane.f32.xlu0 %v96_v21  ;;  %v63_v27 = vsel %vm53_vm0, %v177_v24, 0.0 }
  0xb6   :  { %v179_v25 = vpop.eup %178 }
  0xb7   :  { %v108_v26 = vsel %vm53_vm0, %v179_v25, 0.0 }
  0xb8   :  { %109 = vadd.xlane.f32.xlu0 %v108_v26 }
  0xbc   :  { %64 = vadd.xlane.f32.xlu0 %v63_v27 }
  0xc0   :  { %55 = vadd.xlane.f32.xlu0 %v54_v29 }
 0x141   :  { %v98_v30 = vpop.xlane.xlu0 %97 }
 0x142   :  { %180 = vlog2.f32 %v98_v30 }
 0x145   :  { %v110_v31 = vpop.xlane.xlu0 %109 }
 0x146   :  { %182 = vlog2.f32 %v110_v31 }
 0x147   :  { %184 = vrcp.f32 %v110_v31 }
 0x149   :  { %v65_v32 = vpop.xlane.xlu0 %64 }
 0x14a   :  { %186 = vlog2.f32 %v65_v32 }
 0x14c   :  { %v181_v33 = vpop.eup %180 }
 0x14d   :  { %v100_v34 = vmul.f32 0.6931472, %v181_v33  ;;  %v56_v44 = vpop.xlane.xlu0 %55 }
 0x14f   :  { %v101_v38 = vsub.f32 %v93_v13, %v100_v34 }
 0x150   :  { %v183_v35 = vpop.eup %182 }
 0x151   :  { %v112_v36 = vmul.f32 0.6931472, %v183_v35  ;;  %v185_v37 = vpop.eup %184 }
 0x152   :  { %v115_v42 = vmul.f32 %v185_v37, %v179_v25 }
 0x153   :  { %v113_v39 = vsub.f32 %v105_v17, %v112_v36 }
 0x154   :  { %v187_v40 = vpop.eup %186 }
 0x155   :  { %v67_v41 = vmul.f32 0.6931472, %v187_v40  ;;  %v116_v43 = vsub.f32 %v113_v39, %v101_v38 }
 0x157   :  { %v68_v45 = vadd.f32 %v67_v41, %v59_v10  ;;  %v117_v46 = vmul.f32 %v116_v43, %v115_v42 }
 0x159   :  { %v70_v47 = vsub.f32 %v68_v45, %v56_v44  ;;  %v122_v48 = vsel %vm53_vm0, %v117_v46, 0.0 }
 0x15a   :  { %123 = vadd.xlane.f32.xlu0 %v122_v48 }
 0x15b   :  { %v73_v49 = vsel %vm72_vm2, %v70_v47, 0.0 }
 0x15c   :  { %74 = vadd.xlane.f32.xlu1 %v73_v49 }
 0x1e7   :  { %v124_v50 = vpop.xlane.xlu0 %123 }
 0x1e8   :  { %v125_v51 = vrot.slane %v124_v50, 4 }
 0x1e9   :  { %v75_v52 = vpop.xlane.xlu1 %74 }
 0x1ea   :  { %v126_v53 = vadd.f32 %v125_v51, %v124_v50  ;;  %v76_v54 = vrot.slane %v75_v52, 4 }
 0x1ec   :  { %v127_v55 = vrot.slane %v126_v53, 2  ;;  %v77_v56 = vadd.f32 %v76_v54, %v75_v52 }
 0x1ee   :  { %v128_v57 = vadd.f32 %v127_v55, %v126_v53  ;;  %v78_v58 = vrot.slane %v77_v56, 2 }
 0x1f0   :  { %v79_v59 = vadd.f32 %v78_v58, %v77_v56  ;;  %v129_v60 = vrot.slane %v128_v57, 1 }
 0x1f2   :  { %v80_v61 = vrot.slane %v79_v59, 1  ;;  %v130_v63 = vadd.f32 %v129_v60, %v128_v57 }
 0x1f4   :  { %v81_v62 = vadd.f32 %v80_v61, %v79_v59 }
 0x1f6   :  { %165 = vpush %v81_v62 }
 0x1f7   :  { %167 = vpush %v130_v63 }
 0x227   :  { %s166_s0 = spop %165 }
 0x228   :  { %s139_s1 = smul.f32 0.125, %s166_s0  ;;  %s168_s2 = spop %167 }
 0x229   :  { %s141_s6 = smul.f32 0.00390625, %s168_s2 }
 0x22a   :  { %143 = sst [smem:[#allocation6 + $0x1]] %s139_s1 }
 0x22b   :  { %145 = sst [smem:[#allocation6 + $0x2]] %s141_s6 }
 0x22c   :  { %s146_s7 = sadd.f32 %s141_s6, %s139_s1 }
 0x22e   :  { %148 = sst [smem:[#allocation6]] %s146_s7 }
 0x22f   :  { %219 = shalt.err (!%p216_p10)
}
 0x230   :  { %s226_s15 = smov [#allocation6]  }
 0x231   :  { %156 = dma.smem_to_hbm %s226_s15, 16, %s297_s4, [#allocation5]  }
 0x232   :  { %222 = dma.done.wait [#allocation5], 16  }
 0x233   :  { %223 = vsyncadd [#allocation5], 4294967280 }
 0x234   :  { %160 = sfence }
 0x235   :  { %161 = vsyncpa [#allocation4], 1 }
 0x236   :  { %162 = vsyncpa [#allocation5], 1 }

</bundles_post_ra>
